<compile_context>
chip_gen: v6e
topology: v6e:2x2x1
jax: 0.10.0
libtpu: 0.0.40
codegen_flags: <defaults>
</compile_context>

<pallas_src>
import math

import jax
import jax.numpy as jnp
from jax.experimental import pallas as pl
from jax.experimental.pallas import tpu as pltpu


def _round_up(a, b):
    return pl.cdiv(a, b) * b


def _pad2d(x, rows, cols):
    return jnp.pad(x, ((0, rows - x.shape[0]), (0, cols - x.shape[1])))


# --------------------------------------------------------------------------
# Kernels
# --------------------------------------------------------------------------

def _sage_kernel_std(a_ref, x_nbr_ref, x_self_ref, inv_deg_ref, w_self_ref,
                     w_neigh_ref, b_ref, o_ref, nbr_acc, self_acc):
    # a_ref:       (TM, TK)         bf16  adjacency block (dst rows i, src cols k)
    # x_nbr_ref:   (TK, Fin)        bf16  neighbor features for this k slab
    # x_self_ref:  (TM, Fin)        bf16  destination-node features (k-invariant)
    # inv_deg_ref: (TM, 1)          f32   1 / max(in_degree, 1)
    # w_self_ref:  (Fin, Fout)      bf16
    # w_neigh_ref: (Fin, Fout)      bf16
    # b_ref:       (1, Fout)        f32
    # o_ref:       (TM, Fout)             output tile (written at last k only)
    # nbr_acc:     (TM, Fin)        f32   neighbor-sum accumulator (scratch)
    # self_acc:    (TM, Fout)       f32   self-projection (scratch)
    k = pl.program_id(1)

    @pl.when(k == 0)
    def _init():
        nbr_acc[...] = jnp.zeros_like(nbr_acc)
        # Self projection hoisted off the last-k tail; overlaps with the
        # first K-slab DMAs instead of serializing behind the accumulation.
        self_acc[...] = jnp.dot(x_self_ref[...], w_self_ref[...],
                                preferred_element_type=jnp.float32)

    nbr_acc[...] += jnp.dot(a_ref[...], x_nbr_ref[...],
                            preferred_element_type=jnp.float32)

    @pl.when(k == pl.num_programs(1) - 1)
    def _finalize():
        # Mean aggregation: one VPU multiply with the precomputed 1/deg.
        h_neigh = nbr_acc[...] * inv_deg_ref[...]                  # (TM, Fin) f32
        h = (jnp.dot(h_neigh.astype(w_neigh_ref.dtype), w_neigh_ref[...],
                     preferred_element_type=jnp.float32)
             + self_acc[...] + b_ref[...])                          # (TM, Fout)
        # activation = relu ; norm = None ; num_ffn_layers_in_gnn = 0
        o_ref[...] = jnp.maximum(h, 0.0).astype(o_ref.dtype)


def _sage_kernel_preproj(a_ref, z_nbr_ref, x_self_ref, inv_deg_ref,
                         w_self_ref, b_ref, o_ref, nbr_acc, self_acc):
    # Neighbor features were pre-projected in the wrapper (z = X @ W_neigh),
    # so the streamed slab and the accumulator are (., Fout) instead of Fin.
    k = pl.program_id(1)

    @pl.when(k == 0)
    def _init():
        nbr_acc[...] = jnp.zeros_like(nbr_acc)
        self_acc[...] = jnp.dot(x_self_ref[...], w_self_ref[...],
                                preferred_element_type=jnp.float32)

    nbr_acc[...] += jnp.dot(a_ref[...], z_nbr_ref[...],
                            preferred_element_type=jnp.float32)

    @pl.when(k == pl.num_programs(1) - 1)
    def _finalize():
        h = nbr_acc[...] * inv_deg_ref[...] + self_acc[...] + b_ref[...]
        o_ref[...] = jnp.maximum(h, 0.0).astype(o_ref.dtype)


# --------------------------------------------------------------------------
# Wrapper
# --------------------------------------------------------------------------

def sage_conv_forward(adj, x, w_self, w_neigh, bias, *, tile_m=512,
                      tile_k=512):
    """adj: (N, N), x: (N, Fin), w_*: (Fin, Fout) pre-transposed, bias: (Fout,)."""
    n, fin = x.shape
    fout = w_self.shape[1]
    out_dtype = x.dtype
    out_itemsize = jnp.dtype(out_dtype).itemsize

    # Reciprocal in-degree computed once, outside the hot loop.
    deg = jnp.sum(adj.astype(jnp.float32), axis=-1, keepdims=True)
    inv_deg = 1.0 / jnp.maximum(deg, 1.0)                           # (N, 1) f32

    # Lane-dense feature padding (multiples of 128).
    fin_pad = _round_up(fin, 128)
    fout_pad = _round_up(fout, 128)

    # Clamp tiles to the (128-rounded) graph size; keep MXU/lane alignment.
    tile_m = max(128, min(tile_m, _round_up(n, 128)))
    tile_k = max(128, min(tile_k, _round_up(n, 128)))
    n_pad = _round_up(n, math.lcm(tile_m, tile_k))

    # Reassociate the neighbor projection when it shrinks the streamed slab.
    pre_project = fout_pad < fin_pad

    adj_p = _pad2d(adj.astype(jnp.bfloat16), n_pad, n_pad)
    inv_deg_p = _pad2d(inv_deg, n_pad, 1)
    x_self_p = _pad2d(x.astype(jnp.bfloat16), n_pad, fin_pad)
    w_self_p = _pad2d(w_self.astype(jnp.float32), fin_pad,
                      fout_pad).astype(jnp.bfloat16)
    b_p = _pad2d(bias.reshape(1, fout).astype(jnp.float32), 1, fout_pad)

    if pre_project:
        z = jnp.dot(x.astype(jnp.float32), w_neigh.astype(jnp.float32))
        nbr_p = _pad2d(z, n_pad, fout_pad).astype(jnp.bfloat16)
        f_stream = fout_pad
        kernel = _sage_kernel_preproj
    else:
        nbr_p = x_self_p
        f_stream = fin_pad
        kernel = _sage_kernel_std

    grid = (n_pad // tile_m, n_pad // tile_k)

    # k-invariant operands: single buffer (no useless double-buffering).
    single = pl.Buffered(1)

    in_specs = [
        pl.BlockSpec((tile_m, tile_k), lambda i, k: (i, k)),          # adj
        pl.BlockSpec((tile_k, f_stream), lambda i, k: (k, 0)),        # nbr slab
        pl.BlockSpec((tile_m, fin_pad), lambda i, k: (i, 0),
                     pipeline_mode=single),                            # x (self)
        pl.BlockSpec((tile_m, 1), lambda i, k: (i, 0),
                     pipeline_mode=single),                            # 1/deg
        pl.BlockSpec((fin_pad, fout_pad), lambda i, k: (0, 0),
                     pipeline_mode=single),                            # W_self
    ]
    args = [adj_p, nbr_p, x_self_p, inv_deg_p, w_self_p]
    if not pre_project:
        w_neigh_p = _pad2d(w_neigh.astype(jnp.float32), fin_pad,
                           fout_pad).astype(jnp.bfloat16)
        in_specs.append(pl.BlockSpec((fin_pad, fout_pad), lambda i, k: (0, 0),
                                     pipeline_mode=single))            # W_neigh
        args.append(w_neigh_p)
    in_specs.append(pl.BlockSpec((1, fout_pad), lambda i, k: (0, 0),
                                 pipeline_mode=single))                # bias
    args.append(b_p)

    # Working-set based scoped-VMEM limit (capped at 64 MiB -> safe on all gens).
    n_weight_slabs = 1 if pre_project else 2
    vmem_bytes = (
        2 * tile_m * tile_k * 2                       # adj (double buffered)
        + 2 * tile_k * f_stream * 2                   # nbr slab (double buffered)
        + tile_m * fin_pad * 2                        # x_self (Buffered(1))
        + tile_m * 4                                  # 1/deg
        + n_weight_slabs * fin_pad * fout_pad * 2     # weights (Buffered(1))
        + fout_pad * 4                                # bias
        + 2 * tile_m * fout_pad * out_itemsize        # output (double buffered)
        + tile_m * f_stream * 4                       # nbr_acc scratch
        + tile_m * fout_pad * 4)                      # self_acc scratch
    vmem_limit = int(min(64 << 20,
                         max(32 << 20, int(vmem_bytes * 1.5) + (2 << 20))))

    # Advisory cost estimate (counts the real re-streaming of the nbr slab).
    if pre_project:
        flops = (2 * n_pad * n_pad * fout_pad          # aggregation matmul
                 + 2 * n_pad * fin_pad * fout_pad)     # self projection
    else:
        flops = (2 * n_pad * n_pad * fin_pad           # aggregation matmul
                 + 2 * 2 * n_pad * fin_pad * fout_pad) # self + neighbor proj
    bytes_accessed = (
        adj_p.size * 2
        + (n_pad // tile_m) * n_pad * f_stream * 2     # nbr slab, re-streamed
        + x_self_p.size * 2
        + n_weight_slabs * fin_pad * fout_pad * 2
        + inv_deg_p.size * 4 + b_p.size * 4
        + n_pad * fout_pad * out_itemsize)

    out = pl.pallas_call(
        kernel,
        out_shape=jax.ShapeDtypeStruct((n_pad, fout_pad), out_dtype),
        grid_spec=pltpu.PrefetchScalarGridSpec(
            num_scalar_prefetch=0,
            grid=grid,
            in_specs=in_specs,
            out_specs=pl.BlockSpec((tile_m, fout_pad), lambda i, k: (i, 0)),
            scratch_shapes=[pltpu.VMEM((tile_m, f_stream), jnp.float32),
                            pltpu.VMEM((tile_m, fout_pad), jnp.float32)],
        ),
        compiler_params=pltpu.CompilerParams(
            dimension_semantics=("parallel", "arbitrary"),
            vmem_limit_bytes=vmem_limit),
        cost_estimate=pl.CostEstimate(flops=int(flops), transcendentals=0,
                                      bytes_accessed=int(bytes_accessed)),
    )(*args)

    return out[:n, :fout]


def sage_conv_module(adj, inputs, params, **kw):
    """Mirrors SAGEConv.forward: dict in, dict out."""
    x = inputs["_N"]
    h = sage_conv_forward(adj, x, params["w_self"], params["w_neigh"],
                          params["bias"], **kw)
    # norm=None, num_ffn_layers_in_gnn=0, dropout=0.0 -> nothing else to do.
    return {"_N": h}


# --------------------------------------------------------------------------
# Reference + tests
# --------------------------------------------------------------------------

def _reference(adj, x, w_self, w_neigh, bias):
    a = adj.astype(jnp.float32)
    deg = jnp.maximum(a.sum(-1, keepdims=True), 1.0)
    h_neigh = (a @ x.astype(jnp.float32)) / deg
    h = x.astype(jnp.float32) @ w_self + h_neigh @ w_neigh + bias[None, :]
    return jnp.maximum(h, 0.0)


def _run_case(key, n, fin, fout, **kw):
    k_adj, k_x, k_ws, k_wn, k_b = jax.random.split(key, 5)

    # Deterministic synthetic graph: dense adjacency (j -> i), no self loops.
    adj = (jax.random.uniform(k_adj, (n, n)) < 0.35).astype(jnp.float32)
    adj = adj * (1.0 - jnp.eye(n, dtype=jnp.float32))

    x = jax.random.normal(k_x, (n, fin), dtype=jnp.float32)

    # Parameters (dglnn.SAGEConv fc_self / fc_neigh / bias), pre-transposed.
    bound = 1.0 / (fin ** 0.5)
    w_self = jax.random.uniform(k_ws, (fin, fout), minval=-bound,
                                maxval=bound, dtype=jnp.float32)
    w_neigh = jax.random.uniform(k_wn, (fin, fout), minval=-bound,
                                 maxval=bound, dtype=jnp.float32)
    bias = jax.random.uniform(k_b, (fout,), minval=-bound, maxval=bound,
                              dtype=jnp.float32)

    params = {"w_self": w_self, "w_neigh": w_neigh, "bias": bias}
    out = sage_conv_module(adj, {"_N": x}, params, **kw)
    h = jax.block_until_ready(out["_N"])

    ref = _reference(adj, x, w_self, w_neigh, bias)
    assert h.shape == (n, fout)
    # bf16 MXU operands (f32 accumulate) vs f32 reference -> loose tolerance.
    assert jnp.allclose(h, ref, atol=5e-2, rtol=5e-2), \
        float(jnp.max(jnp.abs(h - ref)))


if __name__ == "__main__":
    key = jax.random.PRNGKey(0)
    k1, k2, k3 = jax.random.split(key, 3)
    # single tile after padding (grid 1x1), standard path
    _run_case(k1, 16, 32, 32)
    # small tiles forced -> multi-tile K accumulation + padding slice, std path
    _run_case(k2, 200, 48, 40, tile_m=128, tile_k=128)
    # default large tiles, Fout < Fin -> pre-projected neighbor path, grid 2x2
    _run_case(k3, 640, 256, 128)
    print("KERNEL_OK")
</pallas_src>

<mosaic_0001>
module attributes {stable_mosaic.version = 11 : i64} {
  func.func @_sage_kernel_std(%arg0: i32, %arg1: i32, %arg2: memref<128x128xbf16, #tpu.memory_space<vmem>>, %arg3: memref<128x128xbf16, #tpu.memory_space<vmem>>, %arg4: memref<128x128xbf16, #tpu.memory_space<vmem>>, %arg5: memref<128x1xf32, #tpu.memory_space<vmem>>, %arg6: memref<128x128xbf16, #tpu.memory_space<vmem>>, %arg7: memref<128x128xbf16, #tpu.memory_space<vmem>>, %arg8: memref<1x128xf32, #tpu.memory_space<vmem>>, %arg9: memref<128x128xf32, #tpu.memory_space<vmem>>, %arg10: memref<128x128xf32, #tpu.memory_space<vmem>>, %arg11: memref<128x128xf32, #tpu.memory_space<vmem>>) attributes {dimension_semantics = [#tpu.dimension_semantics<parallel>, #tpu.dimension_semantics<arbitrary>], iteration_bounds = array<i64: 1, 1>, scalar_prefetch = 0 : i64, scratch_operands = 2 : i64, tpu.core_type = #tpu.core_type<tc>, window_params = [{transform_indices = @transform_0, window_bounds = array<i64: 128, 128>}, {transform_indices = @transform_1, window_bounds = array<i64: 128, 128>}, {pipeline_mode = #tpu.pipeline_mode<synchronous>, transform_indices = @transform_2, window_bounds = array<i64: 128, 128>}, {pipeline_mode = #tpu.pipeline_mode<synchronous>, transform_indices = @transform_3, window_bounds = array<i64: 128, 1>}, {pipeline_mode = #tpu.pipeline_mode<synchronous>, transform_indices = @transform_4, window_bounds = array<i64: 128, 128>}, {pipeline_mode = #tpu.pipeline_mode<synchronous>, transform_indices = @transform_5, window_bounds = array<i64: 128, 128>}, {pipeline_mode = #tpu.pipeline_mode<synchronous>, transform_indices = @transform_6, window_bounds = array<i64: 1, 128>}, {transform_indices = @transform_7, window_bounds = array<i64: 128, 128>}]} {
    %c0_i32 = arith.constant 0 : i32
    %0 = arith.cmpi eq, %arg1, %c0_i32 : i32
    %1 = arith.extui %0 : i1 to i32
    %c0_i32_0 = arith.constant 0 : i32
    %2 = arith.cmpi ne, %1, %c0_i32_0 : i32
    scf.if %2 {
      %cst_10 = arith.constant 0.000000e+00 : f32
      %12 = vector.broadcast %cst_10 : f32 to vector<128x128xf32>
      %c0_11 = arith.constant 0 : index
      %c0_12 = arith.constant 0 : index
      %13 = vector.load %arg10[%c0_11, %c0_12] : memref<128x128xf32, #tpu.memory_space<vmem>>, vector<128x128xf32>
      tpu.vector_store %arg10[%c0_11, %c0_12], %12 {strides = array<i32>} : memref<128x128xf32, #tpu.memory_space<vmem>>, vector<128x128xf32>,
      %c0_13 = arith.constant 0 : index
      %c0_14 = arith.constant 0 : index
      %14 = vector.load %arg4[%c0_13, %c0_14] : memref<128x128xbf16, #tpu.memory_space<vmem>>, vector<128x128xbf16>
      %c0_15 = arith.constant 0 : index
      %c0_16 = arith.constant 0 : index
      %15 = vector.load %arg6[%c0_15, %c0_16] : memref<128x128xbf16, #tpu.memory_space<vmem>>, vector<128x128xbf16>
      %cst_17 = arith.constant dense<0.000000e+00> : vector<128x128xf32>
      %16 = tpu.matmul %14, %15, %cst_17 {dimension_numbers = #tpu.dot_dimension_numbers<[1], [0], [0], [1], [0, 0, 1, 1], [], []>} : vector<128x128xbf16>, vector<128x128xbf16>, vector<128x128xf32> -> vector<128x128xf32>
      %c0_18 = arith.constant 0 : index
      %c0_19 = arith.constant 0 : index
      %17 = vector.load %arg11[%c0_18, %c0_19] : memref<128x128xf32, #tpu.memory_space<vmem>>, vector<128x128xf32>
      tpu.vector_store %arg11[%c0_18, %c0_19], %16 {strides = array<i32>} : memref<128x128xf32, #tpu.memory_space<vmem>>, vector<128x128xf32>,
    } else {
    }
    %c0 = arith.constant 0 : index
    %c0_1 = arith.constant 0 : index
    %3 = vector.load %arg10[%c0, %c0_1] : memref<128x128xf32, #tpu.memory_space<vmem>>, vector<128x128xf32>
    %c0_2 = arith.constant 0 : index
    %c0_3 = arith.constant 0 : index
    %4 = vector.load %arg2[%c0_2, %c0_3] : memref<128x128xbf16, #tpu.memory_space<vmem>>, vector<128x128xbf16>
    %c0_4 = arith.constant 0 : index
    %c0_5 = arith.constant 0 : index
    %5 = vector.load %arg3[%c0_4, %c0_5] : memref<128x128xbf16, #tpu.memory_space<vmem>>, vector<128x128xbf16>
    %cst = arith.constant dense<0.000000e+00> : vector<128x128xf32>
    %6 = tpu.matmul %4, %5, %cst {dimension_numbers = #tpu.dot_dimension_numbers<[1], [0], [0], [1], [0, 0, 1, 1], [], []>} : vector<128x128xbf16>, vector<128x128xbf16>, vector<128x128xf32> -> vector<128x128xf32>
    %7 = arith.addf %3, %6 : vector<128x128xf32>
    %c0_6 = arith.constant 0 : index
    %c0_7 = arith.constant 0 : index
    %8 = vector.load %arg10[%c0_6, %c0_7] : memref<128x128xf32, #tpu.memory_space<vmem>>, vector<128x128xf32>
    tpu.vector_store %arg10[%c0_6, %c0_7], %7 {strides = array<i32>} : memref<128x128xf32, #tpu.memory_space<vmem>>, vector<128x128xf32>,
    %c0_i32_8 = arith.constant 0 : i32
    %9 = arith.cmpi eq, %arg1, %c0_i32_8 : i32
    %10 = arith.extui %9 : i1 to i32
    %c0_i32_9 = arith.constant 0 : i32
    %11 = arith.cmpi ne, %10, %c0_i32_9 : i32
    scf.if %11 {
      %c0_10 = arith.constant 0 : index
      %c0_11 = arith.constant 0 : index
      %12 = vector.load %arg10[%c0_10, %c0_11] : memref<128x128xf32, #tpu.memory_space<vmem>>, vector<128x128xf32>
      %c0_12 = arith.constant 0 : index
      %c0_13 = arith.constant 0 : index
      %13 = vector.load %arg5[%c0_12, %c0_13] : memref<128x1xf32, #tpu.memory_space<vmem>>, vector<128x1xf32>
      %14 = vector.broadcast %13 : vector<128x1xf32> to vector<128x128xf32>
      %15 = arith.mulf %12, %14 : vector<128x128xf32>
      %16 = arith.truncf %15 : vector<128x128xf32> to vector<128x128xbf16>
      %c0_14 = arith.constant 0 : index
      %c0_15 = arith.constant 0 : index
      %17 = vector.load %arg7[%c0_14, %c0_15] : memref<128x128xbf16, #tpu.memory_space<vmem>>, vector<128x128xbf16>
      %cst_16 = arith.constant dense<0.000000e+00> : vector<128x128xf32>
      %18 = tpu.matmul %16, %17, %cst_16 {dimension_numbers = #tpu.dot_dimension_numbers<[1], [0], [0], [1], [0, 0, 1, 1], [], []>} : vector<128x128xbf16>, vector<128x128xbf16>, vector<128x128xf32> -> vector<128x128xf32>
      %c0_17 = arith.constant 0 : index
      %c0_18 = arith.constant 0 : index
      %19 = vector.load %arg11[%c0_17, %c0_18] : memref<128x128xf32, #tpu.memory_space<vmem>>, vector<128x128xf32>
      %20 = arith.addf %18, %19 : vector<128x128xf32>
      %c0_19 = arith.constant 0 : index
      %c0_20 = arith.constant 0 : index
      %21 = vector.load %arg8[%c0_19, %c0_20] : memref<1x128xf32, #tpu.memory_space<vmem>>, vector<1x128xf32>
      %22 = vector.broadcast %21 : vector<1x128xf32> to vector<128x128xf32>
      %23 = arith.addf %20, %22 : vector<128x128xf32>
      %cst_21 = arith.constant 0.000000e+00 : f32
      %24 = vector.broadcast %cst_21 : f32 to vector<128x128xf32>
      %25 = arith.maximumf %23, %24 : vector<128x128xf32>
      %c0_22 = arith.constant 0 : index
      %c0_23 = arith.constant 0 : index
      %26 = vector.load %arg9[%c0_22, %c0_23] : memref<128x128xf32, #tpu.memory_space<vmem>>, vector<128x128xf32>
      tpu.vector_store %arg9[%c0_22, %c0_23], %25 {strides = array<i32>} : memref<128x128xf32, #tpu.memory_space<vmem>>, vector<128x128xf32>,
    } else {
    }
    return
  }
  func.func @transform_0(%arg0: i32, %arg1: i32) -> (i32, i32) {
    %c0_i32 = arith.constant 0 : i32
    return %arg0, %arg1 : i32, i32
  }
  func.func @transform_1(%arg0: i32, %arg1: i32) -> (i32, i32) {
    %c0_i32 = arith.constant 0 : i32
    %c0_i32_0 = arith.constant 0 : i32
    return %arg1, %c0_i32 : i32, i32
  }
  func.func @transform_2(%arg0: i32, %arg1: i32) -> (i32, i32) {
    %c0_i32 = arith.constant 0 : i32
    %c0_i32_0 = arith.constant 0 : i32
    return %arg0, %c0_i32 : i32, i32
  }
  func.func @transform_3(%arg0: i32, %arg1: i32) -> (i32, i32) {
    %c0_i32 = arith.constant 0 : i32
    %c0_i32_0 = arith.constant 0 : i32
    return %arg0, %c0_i32 : i32, i32
  }
  func.func @transform_4(%arg0: i32, %arg1: i32) -> (i32, i32) {
    %c0_i32 = arith.constant 0 : i32
    %c0_i32_0 = arith.constant 0 : i32
    %c0_i32_1 = arith.constant 0 : i32
    return %c0_i32, %c0_i32_0 : i32, i32
  }
  func.func @transform_5(%arg0: i32, %arg1: i32) -> (i32, i32) {
    %c0_i32 = arith.constant 0 : i32
    %c0_i32_0 = arith.constant 0 : i32
    %c0_i32_1 = arith.constant 0 : i32
    return %c0_i32, %c0_i32_0 : i32, i32
  }
  func.func @transform_6(%arg0: i32, %arg1: i32) -> (i32, i32) {
    %c0_i32 = arith.constant 0 : i32
    %c0_i32_0 = arith.constant 0 : i32
    %c0_i32_1 = arith.constant 0 : i32
    return %c0_i32, %c0_i32_0 : i32, i32
  }
  func.func @transform_7(%arg0: i32, %arg1: i32) -> (i32, i32) {
    %c0_i32 = arith.constant 0 : i32
    %c0_i32_0 = arith.constant 0 : i32
    return %arg0, %c0_i32 : i32, i32
  }
}

</mosaic_0001>

<bundles_post_ra>
// kernel: tpu_custom_call.1
= control target key start
LH: loop header
LB: loop body
LE: loop exit
PB: predicated region body
PF: predicated region fallthrough
CT: control target
= control target key end

     0   :  { %12 = vsyncpa [#allocation5], 0  ;;  %s1520_s0 = inlined_call_operand.vmem [shape: bf16[128,128], index: 0, kind: input, shape index: {}]   ;;  %s1521_s1 = inlined_call_operand.vmem [shape: bf16[128,128], index: 1, kind: input, shape index: {}]   ;;  %s1522_s2 = inlined_call_operand.hbm [shape: bf16[128,128], index: 2, kind: input, shape index: {}]   ;;  %s1523_s3 = inlined_call_operand.vmem [shape: f32[128,1], index: 3, kind: input, shape index: {}]   ;;  %s1524_s4 = inlined_call_operand.hbm [shape: bf16[128,128], index: 4, kind: input, shape index: {}]   ;;  %s1525_s5 = inlined_call_operand.hbm [shape: bf16[128,128], index: 5, kind: input, shape index: {}]   ;;  %s1526_s6 = inlined_call_operand.vmem [shape: f32[1,128], index: 6, kind: input, shape index: {}]   ;;  %s1527_s7 = inlined_call_operand.hbm [shape: f32[128,128], index: 7, kind: output, shape index: {}]  }
   0x1   :  { %13 = vsyncpa [#allocation8], 0 }
   0x2   :  { %14 = vsyncpa [#allocation6], 0  ;;  %s1330_s24 = smov [#allocation7]   ;;  %s1331_s26 = smov [#allocation4]  }
   0x3   :  { %s38_s25 = sshll.u32 %s1330_s24, 4  ;;  %s24_s27 = sshll.u32 %s1331_s26, 4  ;;  %s39_s25 = int_to_ptr.vmem [resolvable:$true] %s38_s25  ;;  %s25_s27 = int_to_ptr.vmem [resolvable:$true] %s24_s27 }
   0x4   :  { %s1252_s28 = scalar_lea.vmem %s39_s25, 1024  ;;  %p1257_p1 = scmp.lt.s32.totalorder %s39_s25, %s39_s25 }
   0x5   :  { %p1253_p0 = scmp.ne.s32.totalorder %s39_s25, %s1252_s28  ;;  %p1258_p2 = scmp.lt.s32.totalorder %s1252_s28, %s1252_s28 }
   0x7   :  { %p1259_p3 = por %p1258_p2, %p1257_p1 }
   0x9   :  { %p1260_p4 = pnand %p1259_p3, %p1253_p0 }
   0xb   :  { %1263 = shalt.err (!%p1260_p4)
}
   0xc   :  { %s1332_s29 = smov 64   ;;  %s1333_s30 = smov 4  }
   0xd   :  { %44 = dma.hbm_to_vmem [thread:$0]  %s1524_s4, 1024, %s39_s25, [#allocation8], %s1332_s29, %s1332_s29, %s1333_s30  }
   0xe   :  { %s1272_s10 = scalar_lea.vmem %s25_s27, 1024  ;;  %p1277_p6 = scmp.lt.s32.totalorder %s25_s27, %s25_s27 }
   0xf   :  { %p1273_p5 = scmp.ne.s32.totalorder %s25_s27, %s1272_s10  ;;  %p1278_p7 = scmp.lt.s32.totalorder %s1272_s10, %s1272_s10 }
  0x11   :  { %p1279_p8 = por %p1278_p7, %p1277_p6 }
  0x13   :  { %p1280_p9 = pnand %p1279_p8, %p1273_p5 }
  0x15   :  { %1283 = shalt.err (!%p1280_p9)
}
  0x16   :  { %30 = dma.hbm_to_vmem [thread:$0]  %s1522_s2, 1024, %s25_s27, [#allocation5], %s1332_s29, %s1332_s29, %s1333_s30  }
  0x17   :  { %s1334_s13 = smov [#allocation9]  }
  0x18   :  { %s50_s14 = sshll.u32 %s1334_s13, 4  ;;  %s51_s14 = int_to_ptr.vmem [resolvable:$true] %s50_s14 }
  0x19   :  { %s1292_s15 = scalar_lea.vmem %s51_s14, 1024  ;;  %p1297_p11 = scmp.lt.s32.totalorder %s51_s14, %s51_s14 }
  0x1a   :  { %p1293_p10 = scmp.ne.s32.totalorder %s51_s14, %s1292_s15  ;;  %p1298_p12 = scmp.lt.s32.totalorder %s1292_s15, %s1292_s15 }
  0x1c   :  { %p1299_p13 = por %p1298_p12, %p1297_p11 }
  0x1e   :  { %p1300_p0 = pnand %p1299_p13, %p1293_p10 }
  0x20   :  { %1303 = shalt.err (!%p1300_p0)
}
  0x21   :  { %56 = dma.hbm_to_vmem [thread:$0]  %s1525_s5, 1024, %s51_s14, [#allocation8], %s1332_s29, %s1332_s29, %s1333_s30  }
  0x22   :  { %1324 = dma.done.wait [#allocation5], 1024  }
  0x23   :  { %1325 = vsyncadd [#allocation5], 4294966272 }
  0x24   :  { %1326 = dma.done.wait [#allocation8], 2048  }
  0x25   :  { %1327 = vsyncadd [#allocation8], 4294965248  ;;  %v1335_v0 = vmov 0   ;;  %v1204_v1 = vld [vmem:[%s1521_s1 + $0x38] sm:$0xff]   ;;  %v1205_v2 = vld [vmem:[%s1521_s1 + $0x30] sm:$0xff]  }
  0x26   :  { %1203 = vset.pattern.permute.xlu1 %v1335_v0  ;;  %1202 = vset.pattern.permute.xlu0 %v1335_v0  ;;  %v1206_v3 = vld [vmem:[%s1521_s1 + $0x28] sm:$0xff]   ;;  %v1207_v4 = vld [vmem:[%s1521_s1 + $0x20] sm:$0xff]   ;;  %v1208_v6 = vld [vmem:[%s1521_s1 + $0x18] sm:$0xff]  }
  0x27   :  { %1113 = vmatprep.subr.bf16.mxu1 %v1204_v1  ;;  %v1212_v5 = vld [vmem:[%s1520_s0] sm:$0xff]   ;;  %v1209_v7 = vld [vmem:[%s1521_s1 + $0x10] sm:$0xff]   ;;  %v631_v10 = vld [vmem:[%s1523_s3 + $0x48] sm:$0xff] }
  0x28   :  { %1114 = vmatpush3.bf16.msra.mxu1 %v1204_v1  ;;  %1129 = vmatprep.mubr.bf16.mxu1 %v1212_v5  ;;  %v630_v8 = vld [vmem:[%s1523_s3 + $0x40] sm:$0xff]  ;;  %v623_v11 = vld [vmem:[%s1523_s3 + $0x8] sm:$0xff]  ;;  %v625_v13 = vld [vmem:[%s1523_s3 + $0x18] sm:$0xff] }
  0x29   :  { %1115 = vmatprep.subr.bf16.mxu1 %v1205_v2  ;;  %v622_v9 = vld [vmem:[%s1523_s3] sm:$0xff]  ;;  %680 = vperm.xlu1 %1203, %v630_v8   ;;  %v1210_v12 = vld [vmem:[%s1521_s1 + $0x8] sm:$0xff]   ;;  %v624_v14 = vld [vmem:[%s1523_s3 + $0x10] sm:$0xff] }
  0x2a   :  { %640 = vperm.xlu0 %1202, %v622_v9   ;;  %v1220_v15 = vld [vmem:[#allocation7 + $0x38] sm:$0xff]   ;;  %v1221_v16 = vld [vmem:[#allocation7 + $0x30] sm:$0xff]   ;;  %v1211_v17 = vld [vmem:[%s1521_s1] sm:$0xff]  }
  0x2b   :  { %1081 = vmatprep.subr.bf16.mxu0 %v1220_v15  ;;  %v633_v18 = vld [vmem:[%s1523_s3 + $0x58] sm:$0xff]  ;;  %v632_v19 = vld [vmem:[%s1523_s3 + $0x50] sm:$0xff]  ;;  %v1222_v20 = vld [vmem:[#allocation7 + $0x28] sm:$0xff]  }
  0x2c   :  { %1116 = vmatpush3.bf16.msra.mxu1 %v1205_v2  ;;  %1082 = vmatpush3.bf16.msra.mxu0 %v1220_v15  ;;  %v1213_v21 = vld [vmem:[%s1520_s0 + $0x8] sm:$0xff]   ;;  %v1214_v23 = vld [vmem:[%s1520_s0 + $0x10] sm:$0xff]   ;;  %v626_v24 = vld [vmem:[%s1523_s3 + $0x20] sm:$0xff] }
  0x2d   :  { %1117 = vmatprep.subr.bf16.mxu1 %v1206_v3  ;;  %685 = vperm.xlu1 %1203, %v631_v10   ;;  %v627_v22 = vld [vmem:[%s1523_s3 + $0x28] sm:$0xff]  ;;  %v1228_v25 = vld [vmem:[#allocation4] sm:$0xff]   ;;  %v1230_v29 = vld [vmem:[#allocation9 + $0x38] sm:$0xff]  }
  0x2e   :  { %645 = vperm.xlu0 %1202, %v623_v11   ;;  %1083 = vmatprep.subr.bf16.mxu0 %v1221_v16  ;;  %v1223_v26 = vld [vmem:[#allocation7 + $0x20] sm:$0xff]   ;;  %v635_v27 = vld [vmem:[%s1523_s3 + $0x68] sm:$0xff]  ;;  %v1224_v30 = vld [vmem:[#allocation7 + $0x18] sm:$0xff]  }
  0x2f   :  { %1097 = vmatprep.mubr.bf16.mxu0 %v1228_v25  ;;  %v634_v28 = vld [vmem:[%s1523_s3 + $0x60] sm:$0xff]  ;;  %v1215_v31 = vld [vmem:[%s1520_s0 + $0x18] sm:$0xff]   ;;  %v1231_v34 = vld [vmem:[#allocation9 + $0x30] sm:$0xff]  }
  0x30   :  { %1118 = vmatpush3.bf16.msra.mxu1 %v1206_v3  ;;  %1084 = vmatpush3.bf16.msra.mxu0 %v1221_v16  ;;  %v629_v32 = vld [vmem:[%s1523_s3 + $0x38] sm:$0xff]  ;;  %v1216_v33 = vld [vmem:[%s1520_s0 + $0x20] sm:$0xff]   ;;  %v628_v35 = vld [vmem:[%s1523_s3 + $0x30] sm:$0xff] }
  0x31   :  { %1119 = vmatprep.subr.bf16.mxu1 %v1207_v4  ;;  %655 = vperm.xlu1 %1203, %v625_v13   ;;  %v1225_v36 = vld [vmem:[#allocation7 + $0x10] sm:$0xff]   ;;  %v637_v37 = vld [vmem:[%s1523_s3 + $0x78] sm:$0xff]  ;;  %v1226_v39 = vld [vmem:[#allocation7 + $0x8] sm:$0xff]  }
  0x32   :  { %650 = vperm.xlu0 %1202, %v624_v14   ;;  %1085 = vmatprep.subr.bf16.mxu0 %v1222_v20  ;;  %v636_v38 = vld [vmem:[%s1523_s3 + $0x70] sm:$0xff]  ;;  %v1234_v40 = vld [vmem:[#allocation9 + $0x28] sm:$0xff]   ;;  %v1227_v43 = vld [vmem:[#allocation7] sm:$0xff]  }
  0x33   :  { %v1217_v41 = vld [vmem:[%s1520_s0 + $0x28] sm:$0xff]   ;;  %v1218_v42 = vld [vmem:[%s1520_s0 + $0x30] sm:$0xff]   ;;  %v1235_v44 = vld [vmem:[#allocation9 + $0x20] sm:$0xff]  }
  0x34   :  { %1120 = vmatpush3.bf16.msra.mxu1 %v1207_v4  ;;  %1086 = vmatpush3.bf16.msra.mxu0 %v1222_v20  ;;  %v1238_v45 = vld [vmem:[#allocation9 + $0x18] sm:$0xff]   ;;  %v1229_v46 = vld [vmem:[#allocation4 + $0x8] sm:$0xff]   ;;  %v1232_v48 = vld [vmem:[#allocation4 + $0x10] sm:$0xff]  }
  0x35   :  { %1121 = vmatprep.subr.bf16.mxu1 %v1208_v6  ;;  %695 = vperm.xlu1 %1203, %v633_v18   ;;  %v1219_v47 = vld [vmem:[%s1520_s0 + $0x38] sm:$0xff]   ;;  %v1236_v50 = vld [vmem:[#allocation4 + $0x20] sm:$0xff]   ;;  %v1237_v51 = vld [vmem:[#allocation4 + $0x28] sm:$0xff]  }
  0x36   :  { %690 = vperm.xlu0 %1202, %v632_v19   ;;  %1087 = vmatprep.subr.bf16.mxu0 %v1223_v26  ;;  %v1233_v49 = vld [vmem:[#allocation4 + $0x18] sm:$0xff]   ;;  %v1239_v52 = vld [vmem:[#allocation9 + $0x10] sm:$0xff]   ;;  %v1242_v55 = vld [vmem:[#allocation9 + $0x8] sm:$0xff]  }
  0x37   :  { %v1240_v53 = vld [vmem:[#allocation4 + $0x30] sm:$0xff]   ;;  %v1241_v54 = vld [vmem:[#allocation4 + $0x38] sm:$0xff]   ;;  %v1243_v56 = vld [vmem:[#allocation9] sm:$0xff]  }
  0x38   :  { %1122 = vmatpush3.bf16.msra.mxu1 %v1208_v6  ;;  %1088 = vmatpush3.bf16.msra.mxu0 %v1223_v26 }
  0x39   :  { %1123 = vmatprep.subr.bf16.mxu1 %v1209_v7  ;;  %665 = vperm.xlu1 %1203, %v627_v22  }
  0x3a   :  { %660 = vperm.xlu0 %1202, %v626_v24   ;;  %1089 = vmatprep.subr.bf16.mxu0 %v1224_v30 }
  0x3c   :  { %1124 = vmatpush3.bf16.msra.mxu1 %v1209_v7  ;;  %1090 = vmatpush3.bf16.msra.mxu0 %v1224_v30 }
  0x3d   :  { %1125 = vmatprep.subr.bf16.mxu1 %v1210_v12  ;;  %705 = vperm.xlu1 %1203, %v635_v27  }
  0x3e   :  { %700 = vperm.xlu0 %1202, %v634_v28   ;;  %1091 = vmatprep.subr.bf16.mxu0 %v1225_v36 }
  0x40   :  { %1126 = vmatpush3.bf16.msra.mxu1 %v1210_v12  ;;  %1092 = vmatpush3.bf16.msra.mxu0 %v1225_v36 }
  0x41   :  { %1127 = vmatprep.subr.bf16.mxu1 %v1211_v17  ;;  %675 = vperm.xlu1 %1203, %v629_v32  }
  0x42   :  { %670 = vperm.xlu0 %1202, %v628_v35   ;;  %1093 = vmatprep.subr.bf16.mxu0 %v1226_v39 }
  0x44   :  { %1128 = vmatpush3.bf16.msra.mxu1 %v1211_v17  ;;  %1094 = vmatpush3.bf16.msra.mxu0 %v1226_v39 }
  0x45   :  { %1177 = vmatprep.subr.bf16.mxu1 %v1230_v29  ;;  %715 = vperm.xlu1 %1203, %v637_v37  }
  0x46   :  { %710 = vperm.xlu0 %1202, %v636_v38   ;;  %1095 = vmatprep.subr.bf16.mxu0 %v1227_v43 }
  0x47   :  { %1130 = vmatmul.mubr.bf16.vlgmr.msra.gmra.mxu1 %v1213_v21 }
  0x48   :  { %1133 = vmatprep.mubr.bf16.mxu1 %v1214_v23  ;;  %1185 = vmatpush3.bf16.msra.mxu1 %v1230_v29 }
  0x49   :  { %1178 = vmatprep.subr.bf16.mxu1 %v1231_v34  ;;  %1096 = vmatpush3.bf16.msra.mxu0 %v1227_v43 }
  0x4a   :  { %1145 = vmatprep.subr.bf16.mxu0 %v1230_v29 }
  0x4c   :  { %1186 = vmatpush3.bf16.msra.mxu1 %v1231_v34  ;;  %1098 = vmatmul.mubr.bf16.vlgmr.msra.gmra.mxu0 %v1229_v46 }
  0x4d   :  { %1179 = vmatprep.subr.bf16.mxu1 %v1234_v40  ;;  %1146 = vmatpush3.bf16.msra.mxu0 %v1230_v29 }
  0x4e   :  { %1147 = vmatprep.subr.bf16.mxu0 %v1231_v34  ;;  %1101 = vmatprep.mubr.bf16.mxu0 %v1232_v48 }
  0x4f   :  { %1134 = vmatmul.mubr.bf16.gmra.mxu1 %v1215_v31 }
  0x50   :  { %1137 = vmatprep.mubr.bf16.mxu1 %v1216_v33  ;;  %1187 = vmatpush3.bf16.msra.mxu1 %v1234_v40 }
  0x51   :  { %1180 = vmatprep.subr.bf16.mxu1 %v1235_v44  ;;  %1148 = vmatpush3.bf16.msra.mxu0 %v1231_v34 }
  0x52   :  { %1149 = vmatprep.subr.bf16.mxu0 %v1234_v40 }
  0x54   :  { %1188 = vmatpush3.bf16.msra.mxu1 %v1235_v44  ;;  %1102 = vmatmul.mubr.bf16.gmra.mxu0 %v1233_v49 }
  0x55   :  { %1181 = vmatprep.subr.bf16.mxu1 %v1238_v45  ;;  %1150 = vmatpush3.bf16.msra.mxu0 %v1234_v40 }
  0x56   :  { %1105 = vmatprep.mubr.bf16.mxu0 %v1236_v50  ;;  %1151 = vmatprep.subr.bf16.mxu0 %v1235_v44 }
  0x57   :  { %1138 = vmatmul.mubr.bf16.gmra.mxu1 %v1217_v41 }
  0x58   :  { %1141 = vmatprep.mubr.bf16.mxu1 %v1218_v42  ;;  %1189 = vmatpush3.bf16.msra.mxu1 %v1238_v45 }
  0x59   :  { %1152 = vmatpush3.bf16.msra.mxu0 %v1235_v44  ;;  %1182 = vmatprep.subr.bf16.mxu1 %v1239_v52 }
  0x5a   :  { %1153 = vmatprep.subr.bf16.mxu0 %v1238_v45 }
  0x5c   :  { %1106 = vmatmul.mubr.bf16.gmra.mxu0 %v1237_v51  ;;  %1190 = vmatpush3.bf16.msra.mxu1 %v1239_v52 }
  0x5d   :  { %1154 = vmatpush3.bf16.msra.mxu0 %v1238_v45  ;;  %1109 = vmatprep.mubr.bf16.mxu0 %v1240_v53 }
  0x5e   :  { %1155 = vmatprep.subr.bf16.mxu0 %v1239_v52  ;;  %1183 = vmatprep.subr.bf16.mxu1 %v1242_v55 }
  0x5f   :  { %1142 = vmatmul.mubr.bf16.gmra.mxu1 %v1219_v47 }
  0x60   :  { %1191 = vmatpush3.bf16.msra.mxu1 %v1242_v55 }
  0x61   :  { %1156 = vmatpush3.bf16.msra.mxu0 %v1239_v52  ;;  %1184 = vmatprep.subr.bf16.mxu1 %v1243_v56 }
  0x62   :  { %1157 = vmatprep.subr.bf16.mxu0 %v1242_v55 }
  0x64   :  { %1110 = vmatmul.mubr.bf16.gmra.mxu0 %v1241_v54  ;;  %1192 = vmatpush3.bf16.msra.mxu1 %v1243_v56 }
  0x65   :  { %1158 = vmatpush3.bf16.msra.mxu0 %v1242_v55 }
  0x66   :  { %1159 = vmatprep.subr.bf16.mxu0 %v1243_v56 }
  0x69   :  { %1160 = vmatpush3.bf16.msra.mxu0 %v1243_v56 }
  0xa4   :  { %v681_v57 = vpop.permute.xlu1 %680 }
  0xa5   :  { %v641_v58 = vpop.permute.xlu0 %640 }
  0xa8   :  { %v686_v59 = vpop.permute.xlu1 %685 }
  0xa9   :  { %v646_v60 = vpop.permute.xlu0 %645 }
  0xac   :  { %v656_v61 = vpop.permute.xlu1 %655 }
  0xad   :  { %v651_v62 = vpop.permute.xlu0 %650 }
  0xb0   :  { %v696_v63 = vpop.permute.xlu1 %695 }
  0xb1   :  { %v691_v0 = vpop.permute.xlu0 %690 }
  0xb4   :  { %v666_v2 = vpop.permute.xlu1 %665 }
  0xb5   :  { %v661_v4 = vpop.permute.xlu0 %660 }
  0xb8   :  { %v706_v8 = vpop.permute.xlu1 %705 }
  0xb9   :  { %v701_v13 = vpop.permute.xlu0 %700 }
  0xbc   :  { %v676_v18 = vpop.permute.xlu1 %675 }
  0xbd   :  { %v671_v21 = vpop.permute.xlu0 %670 }
  0xc0   :  { %v716_v40 = vpop.permute.xlu1 %715 }
  0xc1   :  { %v711_v43 = vpop.permute.xlu0 %710 }
 0x107   :  { %v1131_v1 = vpop.f32.mrf.mxu1 }
 0x108   :  { %v720_v11 = vmul.f32 %v1131_v1, %v651_v62 }
 0x109   :  { %v508_v3 = vpop.f32.mrf.mxu1 }
 0x10a   :  { %v718_v9 = vmul.f32 %v641_v58, %v508_v3 }
 0x10b   :  { %v1132_v5 = vpop.f32.mrf.mxu1 }
 0x10c   :  { %v721_v6 = vmul.f32 %v1132_v5, %v656_v61  ;;  %v1099_v49 = vpop.f32.mrf.mxu0 }
 0x10d   :  { %v511_v7 = vpop.f32.mrf.mxu1 }
 0x10e   :  { %v719_v10 = vmul.f32 %v646_v60, %v511_v7  ;;  %v735_v15 = vpack.c.bf16 %v721_v6, %v720_v11  ;;  %v251_v50 = vpop.f32.mrf.mxu0 }
 0x10f   :  { %v1135_v12 = vpop.f32.mrf.mxu1 }
 0x110   :  { %v734_v14 = vpack.c.bf16 %v719_v10, %v718_v9  ;;  %v724_v24 = vmul.f32 %v1135_v12, %v671_v21  ;;  %v1100_v51 = vpop.f32.mrf.mxu0 }
 0x111   :  { %v524_v16 = vpop.f32.mrf.mxu1 }
 0x112   :  { %1161 = vmatprep.mubr.bf16.mxu0 %v734_v14  ;;  %v722_v22 = vmul.f32 %v661_v4, %v524_v16  ;;  %v254_v52 = vpop.f32.mrf.mxu0 }
 0x113   :  { %v1136_v17 = vpop.f32.mrf.mxu1  ;;  %1162 = vmatmul.mubr.bf16.vlgmr.msra.gmra.mxu0 %v735_v15 }
 0x114   :  { %v725_v19 = vmul.f32 %v1136_v17, %v676_v18  ;;  %v1103_v53 = vpop.f32.mrf.mxu0 }
 0x115   :  { %v527_v20 = vpop.f32.mrf.mxu1 }
 0x116   :  { %v723_v23 = vmul.f32 %v666_v2, %v527_v20  ;;  %v737_v27 = vpack.c.bf16 %v725_v19, %v724_v24  ;;  %v267_v54 = vpop.f32.mrf.mxu0  ;;  %v1495_v2 = vld [vmem:[%s1526_s6] ss:$0 sm:$0xff]  ;;  %s1336_s6 = smov [#allocation10]  }
 0x117   :  { %v1139_v25 = vpop.f32.mrf.mxu1  ;;  %s979_s25 = sshll.u32 %s1336_s6, 4  ;;  %s980_s25 = int_to_ptr.vmem [resolvable:$true] %s979_s25 }
 0x118   :  { %v736_v26 = vpack.c.bf16 %v723_v23, %v722_v22  ;;  %v728_v34 = vmul.f32 %v1139_v25, %v691_v0  ;;  %v1104_v55 = vpop.f32.mrf.mxu0  ;;  %s1304_s26 = scalar_lea.vmem %s980_s25, 2048  ;;  %p1309_p2 = scmp.lt.s32.totalorder %s980_s25, %s980_s25 }
 0x119   :  { %v540_v28 = vpop.f32.mrf.mxu1  ;;  %p1305_p1 = scmp.ne.s32.totalorder %s980_s25, %s1304_s26  ;;  %p1310_p3 = scmp.lt.s32.totalorder %s1304_s26, %s1304_s26 }
 0x11a   :  { %1165 = vmatprep.mubr.bf16.mxu0 %v736_v26  ;;  %v726_v32 = vmul.f32 %v681_v57, %v540_v28  ;;  %v270_v56 = vpop.f32.mrf.mxu0 }
 0x11b   :  { %v1140_v29 = vpop.f32.mrf.mxu1  ;;  %1166 = vmatmul.mubr.bf16.gmra.mxu0 %v737_v27  ;;  %p1311_p4 = por %p1310_p3, %p1309_p2 }
 0x11c   :  { %v729_v30 = vmul.f32 %v1140_v29, %v696_v63  ;;  %v1107_v57 = vpop.f32.mrf.mxu0 }
 0x11d   :  { %v543_v31 = vpop.f32.mrf.mxu1  ;;  %p1312_p5 = pnand %p1311_p4, %p1305_p1 }
 0x11e   :  { %v727_v33 = vmul.f32 %v686_v59, %v543_v31  ;;  %v739_v37 = vpack.c.bf16 %v729_v30, %v728_v34  ;;  %v283_v58 = vpop.f32.mrf.mxu0 }
 0x11f   :  { %v1143_v35 = vpop.f32.mrf.mxu1 }
 0x120   :  { %v738_v36 = vpack.c.bf16 %v727_v33, %v726_v32  ;;  %v732_v46 = vmul.f32 %v1143_v35, %v711_v43  ;;  %v1108_v59 = vpop.f32.mrf.mxu0 }
 0x121   :  { %v556_v38 = vpop.f32.mrf.mxu1 }
 0x122   :  { %1169 = vmatprep.mubr.bf16.mxu1 %v738_v36  ;;  %v730_v44 = vmul.f32 %v701_v13, %v556_v38  ;;  %v286_v60 = vpop.f32.mrf.mxu0 }
 0x123   :  { %v1144_v39 = vpop.f32.mrf.mxu1  ;;  %1170 = vmatmul.mubr.bf16.vlgmr.msra.gmra.mxu1 %v739_v37 }
 0x124   :  { %v733_v41 = vmul.f32 %v1144_v39, %v716_v40  ;;  %v1484_v61 = vpop.f32.mrf.mxu0 }
 0x125   :  { %v559_v42 = vpop.f32.mrf.mxu1 }
 0x126   :  { %v731_v45 = vmul.f32 %v706_v8, %v559_v42  ;;  %v741_v48 = vpack.c.bf16 %v733_v41, %v732_v46  ;;  %v1486_v62 = vpop.f32.mrf.mxu0 }
 0x128   :  { %v740_v47 = vpack.c.bf16 %v731_v45, %v730_v44  ;;  %v1488_v63 = vpop.f32.mrf.mxu0 }
 0x12a   :  { %1173 = vmatprep.mubr.bf16.mxu1 %v740_v47  ;;  %v1490_v0 = vpop.f32.mrf.mxu0 }
 0x12b   :  { %1174 = vmatmul.mubr.bf16.gmra.mxu1 %v741_v48 }
 0x1d3   :  { %v1163_v1 = vpop.f32.mrf.mxu0 }
 0x1d4   :  { %v865_v3 = vadd.f32 %v1163_v1, %v1099_v49 }
 0x1d5   :  { %v856_v4 = vpop.f32.mrf.mxu0 }
 0x1d6   :  { %v928_v5 = vadd.f32 %v1495_v2, %v865_v3  ;;  %v857_v6 = vadd.f32 %v856_v4, %v251_v50 }
 0x1d7   :  { %v1164_v7 = vpop.f32.mrf.mxu0 }
 0x1d8   :  { %v944_v8 = vmax.f32 %v928_v5, 0.0  ;;  %v926_v9 = vadd.f32 %v1495_v2, %v857_v6  ;;  %v868_v10 = vadd.f32 %v1164_v7, %v1100_v51 }
 0x1d9   :  { %v859_v11 = vpop.f32.mrf.mxu0 }
 0x1da   :  { %960 = vst [vmem:[#allocation10 + $0x10] sm:$0xff] %v944_v8  ;;  %v942_v12 = vmax.f32 %v926_v9, 0.0  ;;  %v929_v13 = vadd.f32 %v1495_v2, %v868_v10  ;;  %v860_v14 = vadd.f32 %v859_v11, %v254_v52 }
 0x1db   :  { %v1167_v15 = vpop.f32.mrf.mxu0 }
 0x1dc   :  { %958 = vst [vmem:[#allocation10] sm:$0xff] %v942_v12  ;;  %v945_v16 = vmax.f32 %v929_v13, 0.0  ;;  %v927_v17 = vadd.f32 %v1495_v2, %v860_v14  ;;  %v881_v18 = vadd.f32 %v1167_v15, %v1103_v53 }
 0x1dd   :  { %v872_v19 = vpop.f32.mrf.mxu0 }
 0x1de   :  { %961 = vst [vmem:[#allocation10 + $0x18] sm:$0xff] %v945_v16  ;;  %v943_v20 = vmax.f32 %v927_v17, 0.0  ;;  %v932_v21 = vadd.f32 %v1495_v2, %v881_v18  ;;  %v873_v22 = vadd.f32 %v872_v19, %v267_v54 }
 0x1df   :  { %v1168_v23 = vpop.f32.mrf.mxu0 }
 0x1e0   :  { %959 = vst [vmem:[#allocation10 + $0x8] sm:$0xff] %v943_v20  ;;  %v948_v24 = vmax.f32 %v932_v21, 0.0  ;;  %v930_v25 = vadd.f32 %v1495_v2, %v873_v22  ;;  %v884_v26 = vadd.f32 %v1168_v23, %v1104_v55 }
 0x1e1   :  { %v875_v27 = vpop.f32.mrf.mxu0 }
 0x1e2   :  { %964 = vst [vmem:[#allocation10 + $0x30] sm:$0xff] %v948_v24  ;;  %v946_v28 = vmax.f32 %v930_v25, 0.0  ;;  %v933_v29 = vadd.f32 %v1495_v2, %v884_v26  ;;  %v876_v30 = vadd.f32 %v875_v27, %v270_v56 }
 0x1e3   :  { %v1171_v31 = vpop.f32.mrf.mxu1 }
 0x1e4   :  { %962 = vst [vmem:[#allocation10 + $0x20] sm:$0xff] %v946_v28  ;;  %v949_v32 = vmax.f32 %v933_v29, 0.0  ;;  %v931_v33 = vadd.f32 %v1495_v2, %v876_v30  ;;  %v897_v34 = vadd.f32 %v1171_v31, %v1107_v57 }
 0x1e5   :  { %v888_v35 = vpop.f32.mrf.mxu1 }
 0x1e6   :  { %965 = vst [vmem:[#allocation10 + $0x38] sm:$0xff] %v949_v32  ;;  %v947_v36 = vmax.f32 %v931_v33, 0.0  ;;  %v936_v37 = vadd.f32 %v1495_v2, %v897_v34  ;;  %v889_v38 = vadd.f32 %v888_v35, %v283_v58 }
 0x1e7   :  { %v1172_v39 = vpop.f32.mrf.mxu1 }
 0x1e8   :  { %963 = vst [vmem:[#allocation10 + $0x28] sm:$0xff] %v947_v36  ;;  %v952_v40 = vmax.f32 %v936_v37, 0.0  ;;  %v934_v41 = vadd.f32 %v1495_v2, %v889_v38  ;;  %v900_v42 = vadd.f32 %v1172_v39, %v1108_v59 }
 0x1e9   :  { %v891_v43 = vpop.f32.mrf.mxu1 }
 0x1ea   :  { %968 = vst [vmem:[#allocation10 + $0x50] sm:$0xff] %v952_v40  ;;  %v950_v44 = vmax.f32 %v934_v41, 0.0  ;;  %v937_v45 = vadd.f32 %v1495_v2, %v900_v42  ;;  %v892_v46 = vadd.f32 %v891_v43, %v286_v60 }
 0x1eb   :  { %v1175_v47 = vpop.f32.mrf.mxu1 }
 0x1ec   :  { %966 = vst [vmem:[#allocation10 + $0x40] sm:$0xff] %v950_v44  ;;  %v953_v48 = vmax.f32 %v937_v45, 0.0  ;;  %v935_v49 = vadd.f32 %v1495_v2, %v892_v46  ;;  %v913_v50 = vadd.f32 %v1175_v47, %v1484_v61 }
 0x1ed   :  { %v904_v51 = vpop.f32.mrf.mxu1 }
 0x1ee   :  { %969 = vst [vmem:[#allocation10 + $0x58] sm:$0xff] %v953_v48  ;;  %v951_v52 = vmax.f32 %v935_v49, 0.0  ;;  %v940_v53 = vadd.f32 %v1495_v2, %v913_v50  ;;  %v905_v54 = vadd.f32 %v904_v51, %v1486_v62 }
 0x1ef   :  { %v1176_v55 = vpop.f32.mrf.mxu1 }
 0x1f0   :  { %967 = vst [vmem:[#allocation10 + $0x48] sm:$0xff] %v951_v52  ;;  %v956_v56 = vmax.f32 %v940_v53, 0.0  ;;  %v938_v57 = vadd.f32 %v1495_v2, %v905_v54  ;;  %v916_v58 = vadd.f32 %v1176_v55, %v1488_v63 }
 0x1f1   :  { %v907_v59 = vpop.f32.mrf.mxu1 }
 0x1f2   :  { %972 = vst [vmem:[#allocation10 + $0x70] sm:$0xff] %v956_v56  ;;  %v954_v60 = vmax.f32 %v938_v57, 0.0  ;;  %v941_v1 = vadd.f32 %v1495_v2, %v916_v58  ;;  %v908_v61 = vadd.f32 %v907_v59, %v1490_v0 }
 0x1f4   :  { %970 = vst [vmem:[#allocation10 + $0x60] sm:$0xff] %v954_v60  ;;  %v957_v3 = vmax.f32 %v941_v1, 0.0  ;;  %v939_v62 = vadd.f32 %v1495_v2, %v908_v61 }
 0x1f6   :  { %973 = vst [vmem:[#allocation10 + $0x78] sm:$0xff] %v957_v3  ;;  %v955_v4 = vmax.f32 %v939_v62, 0.0 }
 0x1f8   :  { %971 = vst [vmem:[#allocation10 + $0x68] sm:$0xff] %v955_v4 }
 0x1f9   :  { %1315 = shalt.err (!%p1312_p5)
}
 0x1fa   :  { %s1337_s27 = smov 128   ;;  %s1338_s28 = smov 8  }
 0x1fb   :  { %985 = dma.vmem_to_hbm [thread:$0]  %s980_s25, 2048, %s1527_s7, [#allocation6], %s1337_s27, %s1337_s27, %s1338_s28  }
 0x1fc   :  { %1328 = dma.done.wait [#allocation6], 2048  }
 0x1fd   :  { %1329 = vsyncadd [#allocation6], 4294965248 }
 0x1fe   :  { %989 = vsyncpa [#allocation5], 1 }
 0x1ff   :  { %990 = vsyncpa [#allocation8], 1 }
 0x200   :  { %991 = vsyncpa [#allocation6], 1 }

</bundles_post_ra>
